<compile_context>
chip_gen: v5e
topology: v5e:2x2
jax: 0.10.0
libtpu: 0.0.40
codegen_flags: <defaults>
</compile_context>

<pallas_src>
import functools

import jax
import jax.numpy as jnp
from jax.experimental import pallas as pl
from jax.experimental.pallas import tpu as pltpu

EPS_BN = 1e-5

_TM = 256            # rows per tile (cap)
_TN = 512            # output-channel tile (cap, multiple of 128)
_TK = 2048           # reduction tile (cap, multiple of 128)


# ------------------------- per-generation VMEM limits ------------------------

def _vmem_capacity_bytes():
    try:
        info = pltpu.get_tpu_info()
        for name in ("vmem_capacity_bytes", "vmem_size_bytes", "vmem_bytes"):
            cap = getattr(info, name, None)
            if cap:
                return int(cap)
    except Exception:
        pass
    return 64 * 1024 * 1024          # conservative (v7x-sized) fallback


_VMEM_CAP = _vmem_capacity_bytes()
_VMEM_LIMIT = int(0.75 * _VMEM_CAP)                       # ~48 MiB v7x, ~96 MiB v5e/v6e
_FUSED_BUDGET = (48 * 1024 * 1024 if _VMEM_CAP >= 96 * 1024 * 1024
                 else 24 * 1024 * 1024)                   # 48 MiB v5e/v6e, 24 MiB v7x


# ----------------------------- small helpers --------------------------------

def _round_up(x, m):
    return ((x + m - 1) // m) * m


def _pad2d(a, rows, cols):
    r, c = a.shape
    if r == rows and c == cols:
        return a
    return jnp.pad(a, ((0, rows - r), (0, cols - c)))


def _pick_tm(M, n_layers, cap=_TM):
    """M-tile for the fused kernel."""
    tm = min(cap, _round_up(M, 8))
    if n_layers > 1:
        # Live f32 intermediate (tm x 128) + its bf16 copy presses on the
        # 64-vreg file on v5e; cap tm to avoid spill stores.
        tm = min(tm, 128)
    if M >= 16:
        # Ensure >= 2 M-grid steps so ("parallel",) can shard across v7x's 2 TCs.
        tm = min(tm, _round_up((M + 1) // 2, 8))
    return max(tm, 8)


# ------------------------- tiled Linear(+shift,+ReLU) ------------------------
# out = act(x @ w + shift), K-accumulated on an (M, N, K) grid.

def _linear_kernel(x_ref, w_ref, shift_ref, o_ref, acc_ref, *, relu):
    @pl.when(pl.program_id(2) == 0)
    def _():
        acc_ref[...] = jnp.zeros_like(acc_ref)

    acc_ref[...] += jnp.dot(x_ref[...], w_ref[...],
                            preferred_element_type=jnp.float32)

    @pl.when(pl.program_id(2) == pl.num_programs(2) - 1)
    def _():
        y = acc_ref[...] + shift_ref[...]
        if relu:
            y = jnp.maximum(y, 0.0)
        o_ref[...] = y.astype(o_ref.dtype)


def linear_tiled(x, w, shift, relu=False, out_dtype=jnp.float32,
                 keep_padded=False, tm=_TM, tn=_TN, tk=_TK):
    """General tiled fused Linear + folded-BN shift (+ReLU)."""
    M, K = x.shape
    N = w.shape[1]
    tm = min(tm, _round_up(M, 8))
    tn = min(tn, _round_up(N, 128))
    tk = min(tk, _round_up(K, 128))
    Mp, Kp, Np = _round_up(M, tm), _round_up(K, tk), _round_up(N, tn)

    xp = _pad2d(x.astype(jnp.bfloat16), Mp, Kp)            # bf16 feeds the MXU
    wp = _pad2d(w.astype(jnp.bfloat16), Kp, Np)
    sp = _pad2d(shift.reshape(1, N).astype(jnp.float32), 1, Np)

    grid = (Mp // tm, Np // tn, Kp // tk)
    kernel = functools.partial(_linear_kernel, relu=relu)
    out_bytes = 2 if out_dtype == jnp.bfloat16 else 4

    out = pl.pallas_call(
        kernel,
        out_shape=jax.ShapeDtypeStruct((Mp, Np), out_dtype),
        grid_spec=pltpu.PrefetchScalarGridSpec(
            num_scalar_prefetch=0,
            grid=grid,
            in_specs=[
                pl.BlockSpec((tm, tk), lambda i, j, k: (i, k)),
                pl.BlockSpec((tk, tn), lambda i, j, k: (k, j)),
                pl.BlockSpec((1, tn), lambda i, j, k: (0, j)),
            ],
            out_specs=pl.BlockSpec((tm, tn), lambda i, j, k: (i, j)),
            scratch_shapes=[pltpu.VMEM((tm, tn), jnp.float32)],
        ),
        compiler_params=pltpu.CompilerParams(
            dimension_semantics=("parallel", "parallel", "arbitrary"),
            vmem_limit_bytes=_VMEM_LIMIT,
        ),
        cost_estimate=pl.CostEstimate(
            flops=2 * Mp * Np * Kp,
            transcendentals=0,
            bytes_accessed=(Mp * Kp * 2 * (Np // tn)        # x re-read per N tile
                            + Kp * Np * 2 * (Mp // tm)      # w re-read per M tile
                            + Np * 4 * (Mp // tm)           # shift re-read
                            + Mp * Np * out_bytes),         # output writeback
        ),
    )(xp, wp, sp)
    if keep_padded:
        return out
    return out[:M, :N]


def mlp_tiled(x, specs):
    """Tiled fallback: one launch per layer, bf16 padded intermediates kept in
    HBM and fed straight into the next layer (no slice / re-pad)."""
    M = x.shape[0]
    N = specs[-1][0].shape[1]
    y = x
    n_layers = len(specs)
    for li, (w, shift, relu) in enumerate(specs):
        last = (li == n_layers - 1)
        y = linear_tiled(y, w, shift, relu=relu,
                         out_dtype=jnp.float32 if last else jnp.bfloat16,
                         keep_padded=True)
    return y[:M, :N]


# ------------------- fully fused multi-layer MLP kernel ----------------------
# One pallas_call for the whole chain: intermediates never touch HBM.

def _fused_mlp_kernel(*refs, relu_flags):
    x_ref = refs[0]
    o_ref = refs[-1]
    h = x_ref[...]                               # bf16 tile
    for li, relu in enumerate(relu_flags):
        w_ref = refs[1 + 2 * li]
        s_ref = refs[2 + 2 * li]
        h = jnp.dot(h.astype(w_ref.dtype), w_ref[...],
                    preferred_element_type=jnp.float32) + s_ref[...]
        if relu:
            h = jnp.maximum(h, 0.0)
    o_ref[...] = h.astype(o_ref.dtype)


def _fused_vmem_bytes(K, specs, tm):
    """VMEM footprint estimate: only the M-varying x / output tiles are
    double-buffered; grid-invariant weights/shifts are counted once."""
    Kp = _round_up(K, 128)
    total = 2 * tm * Kp * 2                      # x tile (bf16), double-buffered
    d_in = Kp
    for (w, _, _) in specs:
        n_p = _round_up(w.shape[1], 128)
        total += d_in * n_p * 2 + n_p * 4        # weight + shift (single copy)
        total += tm * n_p * 4                    # live f32 intermediate
        d_in = n_p
    total += 2 * tm * d_in * 4                   # output tile (f32), double-buffered
    return total


def fused_mlp(x, specs, tm=None):
    """specs: list of (w, shift, relu). Single kernel, grid over M tiles only."""
    M, K = x.shape
    if tm is None:
        tm = _pick_tm(M, len(specs))
    Mp = _round_up(M, tm)
    Kp = _round_up(K, 128)

    xp = _pad2d(x.astype(jnp.bfloat16), Mp, Kp)
    operands = [xp]
    layer_dims = []
    d_in = Kp
    flops = 0
    weight_bytes = 0
    N = specs[-1][0].shape[1]
    for (w, shift, relu) in specs:
        n = w.shape[1]
        n_p = _round_up(n, 128)
        operands.append(_pad2d(w.astype(jnp.bfloat16), d_in, n_p))
        operands.append(_pad2d(shift.reshape(1, n).astype(jnp.float32), 1, n_p))
        layer_dims.append((d_in, n_p))
        flops += 2 * Mp * d_in * n_p
        weight_bytes += d_in * n_p * 2 + n_p * 4
        d_in = n_p
    Np = d_in
    relu_flags = tuple(r for (_, _, r) in specs)
    kernel = functools.partial(_fused_mlp_kernel, relu_flags=relu_flags)
    bytes_accessed = Mp * Kp * 2 + weight_bytes + Mp * Np * 4

    def _call(single_buffer_weights):
        in_specs = [pl.BlockSpec((tm, Kp), lambda i: (i, 0))]
        for (di, np_) in layer_dims:
            kw = {}
            if single_buffer_weights:
                # Grid-invariant operands: no double-buffering across M steps.
                kw = dict(pipeline_mode=pl.Buffered(1))
            in_specs.append(pl.BlockSpec((di, np_), lambda i: (0, 0), **kw))
            in_specs.append(pl.BlockSpec((1, np_), lambda i: (0, 0), **kw))
        return pl.pallas_call(
            kernel,
            out_shape=jax.ShapeDtypeStruct((Mp, Np), jnp.float32),
            grid_spec=pltpu.PrefetchScalarGridSpec(
                num_scalar_prefetch=0,
                grid=(Mp // tm,),
                in_specs=in_specs,
                out_specs=pl.BlockSpec((tm, Np), lambda i: (i, 0)),
            ),
            compiler_params=pltpu.CompilerParams(
                dimension_semantics=("parallel",),
                vmem_limit_bytes=_VMEM_LIMIT,
            ),
            cost_estimate=pl.CostEstimate(
                flops=flops, transcendentals=0, bytes_accessed=bytes_accessed),
        )(*operands)

    try:
        out = _call(True)
    except Exception:
        # pipeline_mode=pl.Buffered(1) not accepted by this JAX/Mosaic build;
        # retry with default buffering (weights are small, still correct).
        out = _call(False)
    return out[:M, :N]


# ---------------------------- parameter creation -----------------------------

def _fold_bn(gamma, beta, mean, var):
    scale = gamma / jnp.sqrt(var + EPS_BN)
    shift = beta - mean * scale
    return scale, shift


def init_linear_bn(key, d_in, d_out):
    """Linear(d_in, d_out) + BatchNorm1d(d_out), eval-mode, BN folded into w."""
    kw, kb, kbn = jax.random.split(key, 3)
    bound = 1.0 / jnp.sqrt(jnp.float32(d_in))
    w = jax.random.uniform(kw, (d_in, d_out), jnp.float32, -bound, bound)
    b = jax.random.uniform(kb, (d_out,), jnp.float32, -bound, bound)
    k1, k2, k3, k4 = jax.random.split(kbn, 4)
    gamma = 1.0 + 0.1 * jax.random.normal(k1, (d_out,), jnp.float32)
    beta = 0.1 * jax.random.normal(k2, (d_out,), jnp.float32)
    mean = 0.1 * jax.random.normal(k3, (d_out,), jnp.float32)
    var = 0.5 + jnp.abs(jax.random.normal(k4, (d_out,), jnp.float32))
    scale, bn_shift = _fold_bn(gamma, beta, mean, var)
    return dict(w=w * scale[None, :], shift=b * scale + bn_shift)


def make_params(key, in_dim=512, hidden_dim=64, out_dim=64):
    k1, k2, k3, k4 = jax.random.split(key, 4)
    # layer3 uses BatchNorm1d(hidden_dim) in the module; hidden_dim == out_dim
    # with the default configuration, so folding over out_dim is equivalent.
    return {
        'layer1': init_linear_bn(k1, in_dim, hidden_dim),      # Linear+BN+ReLU
        'layer2': init_linear_bn(k2, hidden_dim, hidden_dim),  # Linear+BN+ReLU
        'layer3': init_linear_bn(k3, hidden_dim, out_dim),     # Linear+BN
        'layer4': init_linear_bn(k4, in_dim, out_dim),         # Linear+BN
    }


# --------------------------------- forward -----------------------------------

def projection_mlp_forward(params, x, num_layers=1):
    if num_layers == 3:
        chain = [(params['layer1'], True),
                 (params['layer2'], True),
                 (params['layer3'], False)]
    elif num_layers == 2:
        chain = [(params['layer1'], True),
                 (params['layer3'], False)]
    elif num_layers == 1:
        chain = [(params['layer4'], False)]
    else:
        raise ValueError("num_layers must be 1, 2 or 3")

    specs = [(p['w'], p['shift'], relu) for (p, relu) in chain]
    M, K = x.shape
    tm = _pick_tm(M, len(specs))
    if _fused_vmem_bytes(K, specs, tm) <= _FUSED_BUDGET:
        return fused_mlp(x, specs, tm=tm)      # one kernel for the whole MLP
    return mlp_tiled(x, specs)                 # tiled per-layer fallback


# pure-JAX reference (bf16 matmul inputs, f32 accumulation -> matches kernel)
def reference_forward(params, x, num_layers=1):
    def lin(h, p, relu):
        hb = h.astype(jnp.bfloat16).astype(jnp.float32)
        wb = p['w'].astype(jnp.bfloat16).astype(jnp.float32)
        y = hb @ wb + p['shift']
        return jnp.maximum(y, 0.0) if relu else y

    if num_layers == 3:
        h = lin(x, params['layer1'], True)
        h = lin(h, params['layer2'], True)
        return lin(h, params['layer3'], False)
    if num_layers == 2:
        h = lin(x, params['layer1'], True)
        return lin(h, params['layer3'], False)
    return lin(x, params['layer4'], False)


if __name__ == "__main__":
    key = jax.random.PRNGKey(0)
    kp, kx = jax.random.split(key)
    B, IN_DIM, HID, OUT = 8, 512, 64, 64
    params = make_params(kp, IN_DIM, HID, OUT)
    x = jax.random.normal(kx, (B, IN_DIM), jnp.float32)

    outs = {nl: projection_mlp_forward(params, x, num_layers=nl)
            for nl in (1, 2, 3)}

    # Also exercise the tiled fallback chain (bf16 intermediates, padded
    # hand-off) and the K-accumulating kernel with multiple K steps.
    specs3 = [(params['layer1']['w'], params['layer1']['shift'], True),
              (params['layer2']['w'], params['layer2']['shift'], True),
              (params['layer3']['w'], params['layer3']['shift'], False)]
    tiled3 = mlp_tiled(x, specs3)
    tiled1 = linear_tiled(x, params['layer4']['w'], params['layer4']['shift'],
                          relu=False, tk=128)
    jax.block_until_ready((outs, tiled3, tiled1))

    for nl in (1, 2, 3):
        ref = reference_forward(params, x, num_layers=nl)
        assert outs[nl].shape == (B, OUT)
        assert jnp.allclose(outs[nl], ref, atol=1e-2, rtol=1e-2), f"mismatch nl={nl}"
    ref3 = reference_forward(params, x, num_layers=3)
    assert jnp.allclose(tiled3, ref3, atol=1e-2, rtol=1e-2), "tiled chain mismatch"
    assert jnp.allclose(tiled1, outs[1], atol=1e-2, rtol=1e-2), "tiled path mismatch"
    print("KERNEL_OK")
</pallas_src>

<mosaic_0001>
module attributes {stable_mosaic.version = 11 : i64} {
  func.func @_fused_mlp_kernel(%arg0: i32, %arg1: memref<8x512xbf16, #tpu.memory_space<vmem>>, %arg2: memref<512x128xbf16, #tpu.memory_space<vmem>>, %arg3: memref<1x128xf32, #tpu.memory_space<vmem>>, %arg4: memref<8x128xf32, #tpu.memory_space<vmem>>) attributes {dimension_semantics = [#tpu.dimension_semantics<parallel>], iteration_bounds = array<i64: 1>, scalar_prefetch = 0 : i64, scratch_operands = 0 : i64, tpu.core_type = #tpu.core_type<tc>, window_params = [{transform_indices = @transform_0, window_bounds = array<i64: 8, 512>}, {pipeline_mode = #tpu.pipeline_mode<synchronous>, transform_indices = @transform_1, window_bounds = array<i64: 512, 128>}, {pipeline_mode = #tpu.pipeline_mode<synchronous>, transform_indices = @transform_2, window_bounds = array<i64: 1, 128>}, {transform_indices = @transform_3, window_bounds = array<i64: 8, 128>}]} {
    %c0 = arith.constant 0 : index
    %c0_0 = arith.constant 0 : index
    %0 = vector.load %arg1[%c0, %c0_0] : memref<8x512xbf16, #tpu.memory_space<vmem>>, vector<8x512xbf16>
    %c0_1 = arith.constant 0 : index
    %c0_2 = arith.constant 0 : index
    %1 = vector.load %arg2[%c0_1, %c0_2] : memref<512x128xbf16, #tpu.memory_space<vmem>>, vector<512x128xbf16>
    %cst = arith.constant dense<0.000000e+00> : vector<8x128xf32>
    %2 = tpu.matmul %0, %1, %cst {dimension_numbers = #tpu.dot_dimension_numbers<[1], [0], [0], [1], [0, 0, 1, 1], [], []>} : vector<8x512xbf16>, vector<512x128xbf16>, vector<8x128xf32> -> vector<8x128xf32>
    %c0_3 = arith.constant 0 : index
    %c0_4 = arith.constant 0 : index
    %3 = vector.load %arg3[%c0_3, %c0_4] : memref<1x128xf32, #tpu.memory_space<vmem>>, vector<1x128xf32>
    %4 = vector.broadcast %3 : vector<1x128xf32> to vector<8x128xf32>
    %5 = arith.addf %2, %4 : vector<8x128xf32>
    %c0_5 = arith.constant 0 : index
    %c0_6 = arith.constant 0 : index
    %6 = vector.load %arg4[%c0_5, %c0_6] : memref<8x128xf32, #tpu.memory_space<vmem>>, vector<8x128xf32>
    tpu.vector_store %arg4[%c0_5, %c0_6], %5 {strides = array<i32>} : memref<8x128xf32, #tpu.memory_space<vmem>>, vector<8x128xf32>,
    return
  }
  func.func @transform_0(%arg0: i32) -> (i32, i32) {
    %c0_i32 = arith.constant 0 : i32
    %c0_i32_0 = arith.constant 0 : i32
    return %arg0, %c0_i32 : i32, i32
  }
  func.func @transform_1(%arg0: i32) -> (i32, i32) {
    %c0_i32 = arith.constant 0 : i32
    %c0_i32_0 = arith.constant 0 : i32
    %c0_i32_1 = arith.constant 0 : i32
    return %c0_i32, %c0_i32_0 : i32, i32
  }
  func.func @transform_2(%arg0: i32) -> (i32, i32) {
    %c0_i32 = arith.constant 0 : i32
    %c0_i32_0 = arith.constant 0 : i32
    %c0_i32_1 = arith.constant 0 : i32
    return %c0_i32, %c0_i32_0 : i32, i32
  }
  func.func @transform_3(%arg0: i32) -> (i32, i32) {
    %c0_i32 = arith.constant 0 : i32
    %c0_i32_0 = arith.constant 0 : i32
    return %arg0, %c0_i32 : i32, i32
  }
}

module attributes {stable_mosaic.version = 11 : i64} {
  func.func @_fused_mlp_kernel(%arg0: i32, %arg1: memref<8x512xbf16, #tpu.memory_space<vmem>>, %arg2: memref<512x128xbf16, #tpu.memory_space<vmem>>, %arg3: memref<1x128xf32, #tpu.memory_space<vmem>>, %arg4: memref<8x128xf32, #tpu.memory_space<vmem>>) attributes {dimension_semantics = [#tpu.dimension_semantics<parallel>], iteration_bounds = array<i64: 1>, scalar_prefetch = 0 : i64, scratch_operands = 0 : i64, tpu.core_type = #tpu.core_type<tc>, window_params = [{transform_indices = @transform_0, window_bounds = array<i64: 8, 512>}, {pipeline_mode = #tpu.pipeline_mode<synchronous>, transform_indices = @transform_1, window_bounds = array<i64: 512, 128>}, {pipeline_mode = #tpu.pipeline_mode<synchronous>, transform_indices = @transform_2, window_bounds = array<i64: 1, 128>}, {transform_indices = @transform_3, window_bounds = array<i64: 8, 128>}]} {
    %c0 = arith.constant 0 : index
    %c0_0 = arith.constant 0 : index
    %0 = vector.load %arg1[%c0, %c0_0] : memref<8x512xbf16, #tpu.memory_space<vmem>>, vector<8x512xbf16>
    %c0_1 = arith.constant 0 : index
    %c0_2 = arith.constant 0 : index
    %1 = vector.load %arg2[%c0_1, %c0_2] : memref<512x128xbf16, #tpu.memory_space<vmem>>, vector<512x128xbf16>
    %cst = arith.constant dense<0.000000e+00> : vector<8x128xf32>
    %2 = tpu.matmul %0, %1, %cst {dimension_numbers = #tpu.dot_dimension_numbers<[1], [0], [0], [1], [0, 0, 1, 1], [], []>} : vector<8x512xbf16>, vector<512x128xbf16>, vector<8x128xf32> -> vector<8x128xf32>
    %c0_3 = arith.constant 0 : index
    %c0_4 = arith.constant 0 : index
    %3 = vector.load %arg3[%c0_3, %c0_4] : memref<1x128xf32, #tpu.memory_space<vmem>>, vector<1x128xf32>
    %4 = vector.broadcast %3 : vector<1x128xf32> to vector<8x128xf32>
    %5 = arith.addf %2, %4 : vector<8x128xf32>
    %c0_5 = arith.constant 0 : index
    %c0_6 = arith.constant 0 : index
    %6 = vector.load %arg4[%c0_5, %c0_6] : memref<8x128xf32, #tpu.memory_space<vmem>>, vector<8x128xf32>
    tpu.vector_store %arg4[%c0_5, %c0_6], %5 {strides = array<i32>} : memref<8x128xf32, #tpu.memory_space<vmem>>, vector<8x128xf32>,
    return
  }
  func.func @transform_0(%arg0: i32) -> (i32, i32) {
    %c0_i32 = arith.constant 0 : i32
    %c0_i32_0 = arith.constant 0 : i32
    return %arg0, %c0_i32 : i32, i32
  }
  func.func @transform_1(%arg0: i32) -> (i32, i32) {
    %c0_i32 = arith.constant 0 : i32
    %c0_i32_0 = arith.constant 0 : i32
    %c0_i32_1 = arith.constant 0 : i32
    return %c0_i32, %c0_i32_0 : i32, i32
  }
  func.func @transform_2(%arg0: i32) -> (i32, i32) {
    %c0_i32 = arith.constant 0 : i32
    %c0_i32_0 = arith.constant 0 : i32
    %c0_i32_1 = arith.constant 0 : i32
    return %c0_i32, %c0_i32_0 : i32, i32
  }
  func.func @transform_3(%arg0: i32) -> (i32, i32) {
    %c0_i32 = arith.constant 0 : i32
    %c0_i32_0 = arith.constant 0 : i32
    return %arg0, %c0_i32 : i32, i32
  }
}

</mosaic_0001>

<bundles_post_ra>
// kernel: tpu_custom_call.1
= control target key start
LH: loop header
LB: loop body
LE: loop exit
PB: predicated region body
PF: predicated region fallthrough
CT: control target
= control target key end

     0   :  { %8 = vsyncpa [#allocation3], 0  ;;  %s673_s0 = inlined_call_operand.hbm [shape: bf16[8,512], index: 0, kind: input, shape index: {}]   ;;  %s674_s1 = inlined_call_operand.hbm [shape: bf16[512,128], index: 1, kind: input, shape index: {}]   ;;  %s675_s2 = inlined_call_operand.vmem [shape: f32[1,128], index: 2, kind: input, shape index: {}]   ;;  %s676_s3 = inlined_call_operand.hbm [shape: f32[8,128], index: 3, kind: output, shape index: {}]  }
   0x1   :  { %9 = vsyncpa [#allocation6], 0 }
   0x2   :  { %10 = vsyncpa [#allocation4], 0  ;;  %s16_s14 = sshll.u32 %s673_s0, 4  ;;  %s636_s15 = smov [#allocation2]   ;;  %s17_s14 = int_to_ptr.hbm [resolvable:$true] %s16_s14 }
   0x3   :  { %s18_s16 = sshll.u32 %s636_s15, 4  ;;  %s26_s19 = sshll.u32 %s674_s1, 4  ;;  %s19_s16 = int_to_ptr.vmem [resolvable:$true] %s18_s16  ;;  %s27_s19 = int_to_ptr.hbm [resolvable:$true] %s26_s19 }
   0x4   :  { %21 = dma.hbm_to_vmem [thread:$0]  %s17_s14, 256, %s19_s16, [#allocation3]  }
   0x5   :  { %s637_s20 = smov [#allocation5]   ;;  %s638_s22 = smov 64  }
   0x6   :  { %s28_s21 = sshll.u32 %s637_s20, 4  ;;  %s639_s23 = smov 4   ;;  %s29_s21 = int_to_ptr.vmem [resolvable:$true] %s28_s21 }
   0x7   :  { %34 = dma.hbm_to_vmem [thread:$0]  %s27_s19, 4096, %s29_s21, [#allocation6], %s638_s22, %s638_s22, %s639_s23  }
   0x8   :  { %630 = dma.done.wait [#allocation3], 256  }
   0x9   :  { %631 = vsyncadd [#allocation3], 4294967040 }
   0xa   :  { %632 = dma.done.wait [#allocation6], 4096  }
   0xb   :  { %633 = vsyncadd [#allocation6], 4294963200  ;;  %v527_v0 = vld [vmem:[#allocation5 + $0x38] sm:$0xff]  ;;  %v526_v4 = vld [vmem:[#allocation5 + $0x30] sm:$0xff]  ;;  %s640_s24 = smov [#allocation7]   ;;  %s381_s28 = sshll.u32 %s676_s3, 4  ;;  %s382_s28 = int_to_ptr.hbm [resolvable:$true] %s381_s28 }
   0xc   :  { %v535_v1 = vld [vmem:[#allocation5 + $0x78] sm:$0xff]  ;;  %321 = vmatpush.bf16.msra.mxu0 %v527_v0  ;;  %v534_v5 = vld [vmem:[#allocation5 + $0x70] sm:$0xff]  ;;  %v525_v8 = vld [vmem:[#allocation5 + $0x28] sm:$0xff]  ;;  %s379_s25 = sshll.u32 %s640_s24, 4  ;;  %s380_s25 = int_to_ptr.vmem [resolvable:$true] %s379_s25 }
   0xd   :  { %v543_v2 = vld [vmem:[#allocation5 + $0xb8] sm:$0xff]  ;;  %334 = vmatpush.bf16.msra.mxu1 %v535_v1  ;;  %v542_v6 = vld [vmem:[#allocation5 + $0xb0] sm:$0xff]  ;;  %v533_v9 = vld [vmem:[#allocation5 + $0x68] sm:$0xff] }
   0xe   :  { %v551_v3 = vld [vmem:[#allocation5 + $0xf8] sm:$0xff]  ;;  %347 = vmatpush.bf16.msra.mxu2 %v543_v2  ;;  %v550_v7 = vld [vmem:[#allocation5 + $0xf0] sm:$0xff]  ;;  %v541_v10 = vld [vmem:[#allocation5 + $0xa8] sm:$0xff] }
   0xf   :  { %360 = vmatpush.bf16.msra.mxu3 %v551_v3  ;;  %v549_v11 = vld [vmem:[#allocation5 + $0xe8] sm:$0xff]  ;;  %v524_v12 = vld [vmem:[#allocation5 + $0x20] sm:$0xff]  ;;  %v523_v16 = vld [vmem:[#allocation5 + $0x18] sm:$0xff] }
  0x10   :  { %322 = vmatpush.bf16.msra.mxu0 %v526_v4  ;;  %v532_v13 = vld [vmem:[#allocation5 + $0x60] sm:$0xff]  ;;  %v531_v17 = vld [vmem:[#allocation5 + $0x58] sm:$0xff]  ;;  %v522_v20 = vld [vmem:[#allocation5 + $0x10] sm:$0xff] }
  0x11   :  { %335 = vmatpush.bf16.msra.mxu1 %v534_v5  ;;  %v540_v14 = vld [vmem:[#allocation5 + $0xa0] sm:$0xff]  ;;  %v539_v18 = vld [vmem:[#allocation5 + $0x98] sm:$0xff]  ;;  %v530_v21 = vld [vmem:[#allocation5 + $0x50] sm:$0xff] }
  0x12   :  { %348 = vmatpush.bf16.msra.mxu2 %v542_v6  ;;  %v548_v15 = vld [vmem:[#allocation5 + $0xe0] sm:$0xff]  ;;  %v547_v19 = vld [vmem:[#allocation5 + $0xd8] sm:$0xff]  ;;  %v538_v22 = vld [vmem:[#allocation5 + $0x90] sm:$0xff] }
  0x13   :  { %361 = vmatpush.bf16.msra.mxu3 %v550_v7  ;;  %v546_v23 = vld [vmem:[#allocation5 + $0xd0] sm:$0xff]  ;;  %v521_v24 = vld [vmem:[#allocation5 + $0x8] sm:$0xff]  ;;  %v46_v29 = vld [vmem:[#allocation2 + $0x8] sm:$0xff] }
  0x14   :  { %323 = vmatpush.bf16.msra.mxu0 %v525_v8  ;;  %v529_v25 = vld [vmem:[#allocation5 + $0x48] sm:$0xff]  ;;  %v45_v26 = vld [vmem:[#allocation2] sm:$0xff]  ;;  %v520_v32 = vld [vmem:[#allocation5] sm:$0xff]  ;;  %v119_v34 = vunpack.c.l.b16 %v46_v29  ;;  %v120_v35 = vunpack.c.h.b16 %v46_v29 }
  0x15   :  { %336 = vmatpush.bf16.msra.mxu1 %v533_v9  ;;  %v537_v27 = vld [vmem:[#allocation5 + $0x88] sm:$0xff]  ;;  %v117_v30 = vunpack.c.l.b16 %v45_v26  ;;  %v118_v31 = vunpack.c.h.b16 %v45_v26  ;;  %v528_v33 = vld [vmem:[#allocation5 + $0x40] sm:$0xff]  ;;  %v557_v42 = vld [vmem:[%s675_s2] ss:$0 sm:$0xff] }
  0x16   :  { %349 = vmatpush.bf16.msra.mxu2 %v541_v10  ;;  %v545_v28 = vld [vmem:[#allocation5 + $0xc8] sm:$0xff]  ;;  %v536_v36 = vld [vmem:[#allocation5 + $0x80] sm:$0xff]  ;;  %v123_v40 = vpack.c.b16 %v119_v34, %v119_v34  ;;  %v124_v41 = vpack.c.b16 %v120_v35, %v120_v35 }
  0x17   :  { %362 = vmatpush.bf16.msra.mxu3 %v549_v11  ;;  %v544_v37 = vld [vmem:[#allocation5 + $0xc0] sm:$0xff]  ;;  %v121_v38 = vpack.c.b16 %v117_v30, %v117_v30  ;;  %v122_v39 = vpack.c.b16 %v118_v31, %v118_v31 }
  0x18   :  { %324 = vmatpush.bf16.msra.mxu0 %v524_v12 }
  0x19   :  { %337 = vmatpush.bf16.msra.mxu1 %v532_v13 }
  0x1a   :  { %350 = vmatpush.bf16.msra.mxu2 %v540_v14 }
  0x1b   :  { %363 = vmatpush.bf16.msra.mxu3 %v548_v15 }
  0x1c   :  { %325 = vmatpush.bf16.msra.mxu0 %v523_v16 }
  0x1d   :  { %338 = vmatpush.bf16.msra.mxu1 %v531_v17 }
  0x1e   :  { %351 = vmatpush.bf16.msra.mxu2 %v539_v18 }
  0x1f   :  { %364 = vmatpush.bf16.msra.mxu3 %v547_v19 }
  0x20   :  { %326 = vmatpush.bf16.msra.mxu0 %v522_v20 }
  0x21   :  { %339 = vmatpush.bf16.msra.mxu1 %v530_v21 }
  0x22   :  { %352 = vmatpush.bf16.msra.mxu2 %v538_v22 }
  0x23   :  { %365 = vmatpush.bf16.msra.mxu3 %v546_v23 }
  0x24   :  { %327 = vmatpush.bf16.msra.mxu0 %v521_v24 }
  0x25   :  { %340 = vmatpush.bf16.msra.mxu1 %v529_v25 }
  0x26   :  { %353 = vmatpush.bf16.msra.mxu2 %v537_v27 }
  0x27   :  { %366 = vmatpush.bf16.msra.mxu3 %v545_v28 }
  0x28   :  { %328 = vmatpush.bf16.msra.mxu0 %v520_v32 }
  0x29   :  { %341 = vmatpush.bf16.msra.mxu1 %v528_v33 }
  0x2a   :  { %354 = vmatpush.bf16.msra.mxu2 %v536_v36 }
  0x2b   :  { %367 = vmatpush.bf16.msra.mxu3 %v544_v37  ;;  %329 = vmatmul.bf16.vlgmr.msra.gmra.mxu0 %v121_v38 }
  0x2c   :  { %342 = vmatmul.bf16.vlgmr.msra.gmra.mxu1 %v122_v39 }
  0x2d   :  { %355 = vmatmul.bf16.vlgmr.msra.gmra.mxu2 %v123_v40 }
  0x2e   :  { %368 = vmatmul.bf16.vlgmr.msra.gmra.mxu3 %v124_v41 }
  0xa8   :  { %v330_v43 = vpop.f32.mrf.mxu0 }
  0xa9   :  { %v343_v44 = vpop.f32.mrf.mxu1  ;;  %v331_v45 = vadd.f32 %v557_v42, %v330_v43 }
  0xab   :  { %v344_v46 = vadd.f32 %v343_v44, %v331_v45 }
  0xb0   :  { %v356_v47 = vpop.f32.mrf.mxu2  ;;  %v332_v50 = vpop.f32.mrf.mxu0 }
  0xb1   :  { %v369_v48 = vpop.f32.mrf.mxu3  ;;  %v357_v49 = vadd.f32 %v356_v47, %v344_v46  ;;  %v345_v51 = vpop.f32.mrf.mxu1 }
  0xb3   :  { %v370_v52 = vadd.f32 %v369_v48, %v357_v49 }
  0xb5   :  { %373 = vst [vmem:[#allocation7] sm:$0xff] %v370_v52 }
  0xb6   :  { %384 = dma.vmem_to_hbm [thread:$0]  %s380_s25, 128, %s382_s28, [#allocation4]  }
  0xb8   :  { %v358_v53 = vpop.f32.mrf.mxu2 }
  0xb9   :  { %v371_v54 = vpop.f32.mrf.mxu3 }
  0xba   :  { %634 = dma.done.wait [#allocation4], 128  }
  0xbb   :  { %635 = vsyncadd [#allocation4], 4294967168 }
  0xbc   :  { %389 = vsyncpa [#allocation3], 1 }
  0xbd   :  { %390 = vsyncpa [#allocation6], 1 }
  0xbe   :  { %391 = vsyncpa [#allocation4], 1 }

// kernel: tpu_custom_call.1
= control target key start
LH: loop header
LB: loop body
LE: loop exit
PB: predicated region body
PF: predicated region fallthrough
CT: control target
= control target key end

     0   :  { %8 = vsyncpa [#allocation3], 0  ;;  %s673_s0 = inlined_call_operand.hbm [shape: bf16[8,512], index: 0, kind: input, shape index: {}]   ;;  %s674_s1 = inlined_call_operand.hbm [shape: bf16[512,128], index: 1, kind: input, shape index: {}]   ;;  %s675_s2 = inlined_call_operand.vmem [shape: f32[1,128], index: 2, kind: input, shape index: {}]   ;;  %s676_s3 = inlined_call_operand.hbm [shape: f32[8,128], index: 3, kind: output, shape index: {}]  }
   0x1   :  { %9 = vsyncpa [#allocation6], 0 }
   0x2   :  { %10 = vsyncpa [#allocation4], 0  ;;  %s16_s14 = sshll.u32 %s673_s0, 4  ;;  %s636_s15 = smov [#allocation2]   ;;  %s17_s14 = int_to_ptr.hbm [resolvable:$true] %s16_s14 }
   0x3   :  { %s18_s16 = sshll.u32 %s636_s15, 4  ;;  %s26_s19 = sshll.u32 %s674_s1, 4  ;;  %s19_s16 = int_to_ptr.vmem [resolvable:$true] %s18_s16  ;;  %s27_s19 = int_to_ptr.hbm [resolvable:$true] %s26_s19 }
   0x4   :  { %21 = dma.hbm_to_vmem [thread:$0]  %s17_s14, 256, %s19_s16, [#allocation3]  }
   0x5   :  { %s637_s20 = smov [#allocation5]   ;;  %s638_s22 = smov 64  }
   0x6   :  { %s28_s21 = sshll.u32 %s637_s20, 4  ;;  %s639_s23 = smov 4   ;;  %s29_s21 = int_to_ptr.vmem [resolvable:$true] %s28_s21 }
   0x7   :  { %34 = dma.hbm_to_vmem [thread:$0]  %s27_s19, 4096, %s29_s21, [#allocation6], %s638_s22, %s638_s22, %s639_s23  }
   0x8   :  { %630 = dma.done.wait [#allocation3], 256  }
   0x9   :  { %631 = vsyncadd [#allocation3], 4294967040 }
   0xa   :  { %632 = dma.done.wait [#allocation6], 4096  }
   0xb   :  { %633 = vsyncadd [#allocation6], 4294963200  ;;  %v527_v0 = vld [vmem:[#allocation5 + $0x38] sm:$0xff]  ;;  %v526_v4 = vld [vmem:[#allocation5 + $0x30] sm:$0xff]  ;;  %s640_s24 = smov [#allocation7]   ;;  %s381_s28 = sshll.u32 %s676_s3, 4  ;;  %s382_s28 = int_to_ptr.hbm [resolvable:$true] %s381_s28 }
   0xc   :  { %v535_v1 = vld [vmem:[#allocation5 + $0x78] sm:$0xff]  ;;  %321 = vmatpush.bf16.msra.mxu0 %v527_v0  ;;  %v534_v5 = vld [vmem:[#allocation5 + $0x70] sm:$0xff]  ;;  %v525_v8 = vld [vmem:[#allocation5 + $0x28] sm:$0xff]  ;;  %s379_s25 = sshll.u32 %s640_s24, 4  ;;  %s380_s25 = int_to_ptr.vmem [resolvable:$true] %s379_s25 }
   0xd   :  { %v543_v2 = vld [vmem:[#allocation5 + $0xb8] sm:$0xff]  ;;  %334 = vmatpush.bf16.msra.mxu1 %v535_v1  ;;  %v542_v6 = vld [vmem:[#allocation5 + $0xb0] sm:$0xff]  ;;  %v533_v9 = vld [vmem:[#allocation5 + $0x68] sm:$0xff] }
   0xe   :  { %v551_v3 = vld [vmem:[#allocation5 + $0xf8] sm:$0xff]  ;;  %347 = vmatpush.bf16.msra.mxu2 %v543_v2  ;;  %v550_v7 = vld [vmem:[#allocation5 + $0xf0] sm:$0xff]  ;;  %v541_v10 = vld [vmem:[#allocation5 + $0xa8] sm:$0xff] }
   0xf   :  { %360 = vmatpush.bf16.msra.mxu3 %v551_v3  ;;  %v549_v11 = vld [vmem:[#allocation5 + $0xe8] sm:$0xff]  ;;  %v524_v12 = vld [vmem:[#allocation5 + $0x20] sm:$0xff]  ;;  %v523_v16 = vld [vmem:[#allocation5 + $0x18] sm:$0xff] }
  0x10   :  { %322 = vmatpush.bf16.msra.mxu0 %v526_v4  ;;  %v532_v13 = vld [vmem:[#allocation5 + $0x60] sm:$0xff]  ;;  %v531_v17 = vld [vmem:[#allocation5 + $0x58] sm:$0xff]  ;;  %v522_v20 = vld [vmem:[#allocation5 + $0x10] sm:$0xff] }
  0x11   :  { %335 = vmatpush.bf16.msra.mxu1 %v534_v5  ;;  %v540_v14 = vld [vmem:[#allocation5 + $0xa0] sm:$0xff]  ;;  %v539_v18 = vld [vmem:[#allocation5 + $0x98] sm:$0xff]  ;;  %v530_v21 = vld [vmem:[#allocation5 + $0x50] sm:$0xff] }
  0x12   :  { %348 = vmatpush.bf16.msra.mxu2 %v542_v6  ;;  %v548_v15 = vld [vmem:[#allocation5 + $0xe0] sm:$0xff]  ;;  %v547_v19 = vld [vmem:[#allocation5 + $0xd8] sm:$0xff]  ;;  %v538_v22 = vld [vmem:[#allocation5 + $0x90] sm:$0xff] }
  0x13   :  { %361 = vmatpush.bf16.msra.mxu3 %v550_v7  ;;  %v546_v23 = vld [vmem:[#allocation5 + $0xd0] sm:$0xff]  ;;  %v521_v24 = vld [vmem:[#allocation5 + $0x8] sm:$0xff]  ;;  %v46_v29 = vld [vmem:[#allocation2 + $0x8] sm:$0xff] }
  0x14   :  { %323 = vmatpush.bf16.msra.mxu0 %v525_v8  ;;  %v529_v25 = vld [vmem:[#allocation5 + $0x48] sm:$0xff]  ;;  %v45_v26 = vld [vmem:[#allocation2] sm:$0xff]  ;;  %v520_v32 = vld [vmem:[#allocation5] sm:$0xff]  ;;  %v119_v34 = vunpack.c.l.b16 %v46_v29  ;;  %v120_v35 = vunpack.c.h.b16 %v46_v29 }
  0x15   :  { %336 = vmatpush.bf16.msra.mxu1 %v533_v9  ;;  %v537_v27 = vld [vmem:[#allocation5 + $0x88] sm:$0xff]  ;;  %v117_v30 = vunpack.c.l.b16 %v45_v26  ;;  %v118_v31 = vunpack.c.h.b16 %v45_v26  ;;  %v528_v33 = vld [vmem:[#allocation5 + $0x40] sm:$0xff]  ;;  %v557_v42 = vld [vmem:[%s675_s2] ss:$0 sm:$0xff] }
  0x16   :  { %349 = vmatpush.bf16.msra.mxu2 %v541_v10  ;;  %v545_v28 = vld [vmem:[#allocation5 + $0xc8] sm:$0xff]  ;;  %v536_v36 = vld [vmem:[#allocation5 + $0x80] sm:$0xff]  ;;  %v123_v40 = vpack.c.b16 %v119_v34, %v119_v34  ;;  %v124_v41 = vpack.c.b16 %v120_v35, %v120_v35 }
  0x17   :  { %362 = vmatpush.bf16.msra.mxu3 %v549_v11  ;;  %v544_v37 = vld [vmem:[#allocation5 + $0xc0] sm:$0xff]  ;;  %v121_v38 = vpack.c.b16 %v117_v30, %v117_v30  ;;  %v122_v39 = vpack.c.b16 %v118_v31, %v118_v31 }
  0x18   :  { %324 = vmatpush.bf16.msra.mxu0 %v524_v12 }
  0x19   :  { %337 = vmatpush.bf16.msra.mxu1 %v532_v13 }
  0x1a   :  { %350 = vmatpush.bf16.msra.mxu2 %v540_v14 }
  0x1b   :  { %363 = vmatpush.bf16.msra.mxu3 %v548_v15 }
  0x1c   :  { %325 = vmatpush.bf16.msra.mxu0 %v523_v16 }
  0x1d   :  { %338 = vmatpush.bf16.msra.mxu1 %v531_v17 }
  0x1e   :  { %351 = vmatpush.bf16.msra.mxu2 %v539_v18 }
  0x1f   :  { %364 = vmatpush.bf16.msra.mxu3 %v547_v19 }
  0x20   :  { %326 = vmatpush.bf16.msra.mxu0 %v522_v20 }
  0x21   :  { %339 = vmatpush.bf16.msra.mxu1 %v530_v21 }
  0x22   :  { %352 = vmatpush.bf16.msra.mxu2 %v538_v22 }
  0x23   :  { %365 = vmatpush.bf16.msra.mxu3 %v546_v23 }
  0x24   :  { %327 = vmatpush.bf16.msra.mxu0 %v521_v24 }
  0x25   :  { %340 = vmatpush.bf16.msra.mxu1 %v529_v25 }
  0x26   :  { %353 = vmatpush.bf16.msra.mxu2 %v537_v27 }
  0x27   :  { %366 = vmatpush.bf16.msra.mxu3 %v545_v28 }
  0x28   :  { %328 = vmatpush.bf16.msra.mxu0 %v520_v32 }
  0x29   :  { %341 = vmatpush.bf16.msra.mxu1 %v528_v33 }
  0x2a   :  { %354 = vmatpush.bf16.msra.mxu2 %v536_v36 }
  0x2b   :  { %367 = vmatpush.bf16.msra.mxu3 %v544_v37  ;;  %329 = vmatmul.bf16.vlgmr.msra.gmra.mxu0 %v121_v38 }
  0x2c   :  { %342 = vmatmul.bf16.vlgmr.msra.gmra.mxu1 %v122_v39 }
  0x2d   :  { %355 = vmatmul.bf16.vlgmr.msra.gmra.mxu2 %v123_v40 }
  0x2e   :  { %368 = vmatmul.bf16.vlgmr.msra.gmra.mxu3 %v124_v41 }
  0xa8   :  { %v330_v43 = vpop.f32.mrf.mxu0 }
  0xa9   :  { %v343_v44 = vpop.f32.mrf.mxu1  ;;  %v331_v45 = vadd.f32 %v557_v42, %v330_v43 }
  0xab   :  { %v344_v46 = vadd.f32 %v343_v44, %v331_v45 }
  0xb0   :  { %v356_v47 = vpop.f32.mrf.mxu2  ;;  %v332_v50 = vpop.f32.mrf.mxu0 }
  0xb1   :  { %v369_v48 = vpop.f32.mrf.mxu3  ;;  %v357_v49 = vadd.f32 %v356_v47, %v344_v46  ;;  %v345_v51 = vpop.f32.mrf.mxu1 }
  0xb3   :  { %v370_v52 = vadd.f32 %v369_v48, %v357_v49 }
  0xb5   :  { %373 = vst [vmem:[#allocation7] sm:$0xff] %v370_v52 }
  0xb6   :  { %384 = dma.vmem_to_hbm [thread:$0]  %s380_s25, 128, %s382_s28, [#allocation4]  }
  0xb8   :  { %v358_v53 = vpop.f32.mrf.mxu2 }
  0xb9   :  { %v371_v54 = vpop.f32.mrf.mxu3 }
  0xba   :  { %634 = dma.done.wait [#allocation4], 128  }
  0xbb   :  { %635 = vsyncadd [#allocation4], 4294967168 }
  0xbc   :  { %389 = vsyncpa [#allocation3], 1 }
  0xbd   :  { %390 = vsyncpa [#allocation6], 1 }
  0xbe   :  { %391 = vsyncpa [#allocation4], 1 }

</bundles_post_ra>
